<compile_context>
chip_gen: v5e
topology: v5e:2x2
jax: 0.10.0
libtpu: 0.0.40
codegen_flags: <defaults>
</compile_context>

<pallas_src>
import math
from typing import Optional

import numpy as np
import jax
import jax.numpy as jnp
from jax.experimental import pallas as pl
from jax.experimental.pallas import tpu as pltpu

LRELU_SLOPE = 0.1
MM_DTYPE = jnp.bfloat16          # MXU operand dtype (accumulation stays f32)


# ---------------------------------------------------------------------------
# Generation-aware VMEM budgeting / tile picking
# ---------------------------------------------------------------------------

def _round_up(v, m):
    return ((v + m - 1) // m) * m


def _vmem_capacity():
    cap = 128 * 1024 * 1024
    try:
        cap = int(getattr(pltpu.get_tpu_info(), "vmem_capacity_bytes", cap))
    except Exception:
        pass
    return cap


_VMEM_CAP = _vmem_capacity()
# explicit scoped-VMEM ceiling: generous on v5e/v6e (128 MiB physical), capped on v7x (64 MiB)
_VMEM_LIMIT = int(min(_VMEM_CAP * 3 // 4, 96 * 1024 * 1024))
# rough per-grid-step working-set budget used to pick lane-tile sizes
_STEP_BUDGET = int(min(_VMEM_CAP // 6, 20 * 1024 * 1024))


def _compiler_params(*sem):
    return pltpu.CompilerParams(dimension_semantics=sem, vmem_limit_bytes=_VMEM_LIMIT)


def _pick_tl(l_out, c_in, c_out, k_eff, halo_pad, cap=2048):
    """Largest lane tile (multiple of 128 and of halo_pad) fitting the per-step budget."""
    tl = cap
    while tl > 128:
        est = (2 * 4 * (c_in * (tl + halo_pad) + c_out * tl)   # double-buffered f32 I/O
               + 2 * k_eff * c_in * tl                         # bf16 im2col scratch
               + 2 * k_eff * c_in * c_out                      # bf16 weights (resident)
               + 4 * c_out * tl)                               # f32 accumulator / temps
        if est <= _STEP_BUDGET:
            break
        tl //= 2
    tl = max(tl, 128)
    tl = min(tl, _round_up(max(l_out, 1), 128))
    if halo_pad:
        tl = _round_up(max(tl, halo_pad), halo_pad)
    return tl


def _lrelu(x, slope):
    return jnp.where(x >= 0, x, slope * x)


# ---------------------------------------------------------------------------
# Tiled matmul (used by the fractional-rate interpolation fallback)
# ---------------------------------------------------------------------------

def _mm_kernel(a_ref, b_ref, o_ref, acc_ref):
    @pl.when(pl.program_id(2) == 0)
    def _():
        acc_ref[...] = jnp.zeros_like(acc_ref)

    acc_ref[...] += jnp.dot(a_ref[...].astype(MM_DTYPE), b_ref[...].astype(MM_DTYPE),
                            preferred_element_type=jnp.float32)

    @pl.when(pl.program_id(2) == pl.num_programs(2) - 1)
    def _():
        o_ref[...] = acc_ref[...].astype(o_ref.dtype)


def tiled_matmul(a, b, *, tm=256, tn=512, tk=512):
    """(R, K) @ (K, N) -> (R, N); bf16 on the MXU, f32 accumulation."""
    R, K = a.shape
    _, N = b.shape
    tm = min(tm, _round_up(R, 8))
    tk = min(tk, _round_up(K, 128))
    tn = min(tn, _round_up(N, 128))
    Rp, Kp, Np = _round_up(R, tm), _round_up(K, tk), _round_up(N, tn)
    a_p = jnp.pad(a, ((0, Rp - R), (0, Kp - K)))
    b_p = jnp.pad(b, ((0, Kp - K), (0, Np - N)))
    out = pl.pallas_call(
        _mm_kernel,
        grid=(Rp // tm, Np // tn, Kp // tk),
        in_specs=[pl.BlockSpec((tm, tk), lambda i, j, k: (i, k)),
                  pl.BlockSpec((tk, tn), lambda i, j, k: (k, j))],
        out_specs=pl.BlockSpec((tm, tn), lambda i, j, k: (i, j)),
        out_shape=jax.ShapeDtypeStruct((Rp, Np), jnp.float32),
        scratch_shapes=[pltpu.VMEM((tm, tn), jnp.float32)],
        compiler_params=_compiler_params("parallel", "parallel", "arbitrary"),
    )(a_p, b_p)
    return out[:R, :N]


# ---------------------------------------------------------------------------
# F.interpolate(mode='linear', align_corners=False)
#   * integer scale (p/1): dedicated 2-tap polyphase VPU kernel (O(L) work)
#   * fractional scale:    dense (L_in x L_out) bf16 matrix on the MXU
# ---------------------------------------------------------------------------

def _linear_interp_matrix(L_in, scale):
    L_out = int(np.floor(L_in * scale))
    o = np.arange(L_out)
    src = np.maximum((o + 0.5) / scale - 0.5, 0.0)
    i0 = np.minimum(np.floor(src).astype(np.int64), L_in - 1)
    i1 = np.minimum(i0 + 1, L_in - 1)
    lam = (src - i0).astype(np.float32)
    M = np.zeros((L_in, L_out), np.float32)
    M[i0, o] += 1.0 - lam
    M[i1, o] += lam
    return jnp.asarray(M).astype(MM_DTYPE)       # bf16: halves HBM traffic of the fallback


def linear_interpolate_dense(z, scale):
    """z: (B, C, L) -> (B, C, floor(L*scale)) via a banded matmul (fallback path)."""
    B, C, L = z.shape
    M = _linear_interp_matrix(L, scale)
    L_out = M.shape[1]
    y = tiled_matmul(z.reshape(B * C, L), M)
    return y.reshape(B, C, L_out)


def linear_interpolate_int(z, p):
    """Exact integer-scale linear interpolation (align_corners=False).

    For o = m*p + r:  y[o] = (1-lam_r) * x_rep[m + off_r] + lam_r * x_rep[m + off_r + 1]
    where x_rep is the input replicate-padded by one sample on each side (this
    reproduces torch's src clamp at the left edge and the i1 clamp at the right
    edge exactly).  One VPU multiply-add pair per phase, lane-dense output planes.
    """
    B, C, L = z.shape
    R = B * C
    x2 = z.reshape(R, L)
    x_rep = jnp.concatenate([x2[:, :1], x2, x2[:, -1:]], axis=-1)      # (R, L+2)

    offs, lams = [], []
    for r in range(p):
        s = (r + 0.5) / p - 0.5
        a = int(np.floor(s))
        offs.append(a + 1)                      # index into the replicate-padded input
        lams.append(float(s - a))

    TR = min(256, _round_up(R, 8))
    TL = 2048
    while TL > 128 and 4 * TR * (2 * (TL + 128) + (p + 2) * TL) > _STEP_BUDGET:
        TL //= 2
    TL = min(TL, _round_up(L, 128))             # both multiples of 128
    HP = 128
    ratio = TL // HP

    n_r = pl.cdiv(R, TR)
    n_t = pl.cdiv(L, TL)
    Rp = n_r * TR
    Lp = (n_t + 1) * TL                          # room for the trailing halo block
    x_p = jnp.pad(x_rep, ((0, Rp - R), (0, Lp - (L + 2))))

    def kernel(x_ref, xh_ref, o_ref):
        xw = jnp.concatenate([x_ref[...], xh_ref[...]], axis=-1)       # (TR, TL + 128)
        for r in range(p):
            a = offs[r]
            o_ref[r] = ((1.0 - lams[r]) * xw[:, a:a + TL]
                        + lams[r] * xw[:, a + 1:a + 1 + TL]).astype(o_ref.dtype)

    y3 = pl.pallas_call(
        kernel,
        grid=(n_r, n_t),
        in_specs=[pl.BlockSpec((TR, TL), lambda i, l: (i, l)),
                  pl.BlockSpec((TR, HP), lambda i, l: (i, (l + 1) * ratio))],
        out_specs=pl.BlockSpec((p, TR, TL), lambda i, l: (0, i, l)),
        out_shape=jax.ShapeDtypeStruct((p, Rp, n_t * TL), jnp.float32),
        compiler_params=_compiler_params("parallel", "parallel"),
    )(x_p, x_p)
    # interleave phases: y[row, m*p + r] = y3[r, row, m]
    y = jnp.transpose(y3[:, :R, :L], (1, 2, 0)).reshape(R, L * p)
    return y.reshape(B, C, L * p)


def interpolate_rational(z, scale, p, q):
    if q == 1:
        if p == 1:
            return z
        if p <= 32:
            return linear_interpolate_int(z, p)
    # TODO(synk): general rational (q > 1) resampling still uses the dense banded
    # matmul; a strided 2-tap polyphase kernel would remove the O(L^2) MACs there too.
    return linear_interpolate_dense(z, scale)


# ---------------------------------------------------------------------------
# Length-tiled Conv1d (stride 1, dilation d) with fused activations
# ---------------------------------------------------------------------------

def _make_conv_kernel(K, dilation, TL, has_halo, in_slope, out_tanh, vpu):
    def kernel(*refs):
        if has_halo:
            x_ref, xh_ref, w_ref, b_ref, o_ref = refs
            xw = jnp.concatenate([x_ref[0], xh_ref[0]], axis=-1)
        else:
            x_ref, w_ref, b_ref, o_ref = refs
            xw = x_ref[0]
        if in_slope is not None:
            xw = _lrelu(xw, in_slope)
        if vpu:
            # C_out == 1: per-tap VPU multiply-accumulate + sublane reduce; keeps the MXU free.
            acc = jnp.zeros((xw.shape[0], TL), jnp.float32)
            for k in range(K):
                acc = acc + w_ref[:, k:k + 1] * xw[:, k * dilation:k * dilation + TL]
            y = jnp.sum(acc, axis=0, keepdims=True) + b_ref[...]
        else:
            cols = [xw[:, k * dilation:k * dilation + TL] for k in range(K)]
            xcol = (cols[0] if K == 1 else jnp.concatenate(cols, axis=0)).astype(MM_DTYPE)
            y = jnp.dot(w_ref[...], xcol, preferred_element_type=jnp.float32) + b_ref[...]
        if out_tanh:
            y = jnp.tanh(y)
        o_ref[0] = y.astype(o_ref.dtype)
    return kernel


def conv1d(x, prep, *, in_lrelu_slope=None, out_tanh=False):
    """PyTorch-style Conv1d (stride 1), length-tiled, taps stacked into one matmul."""
    B, C_in, L = x.shape
    K, d, p, C_out = prep["K"], prep["d"], prep["p"], prep["C_out"]
    vpu = prep.get("vpu", False)
    L_out = L + 2 * p - d * (K - 1)
    halo = d * (K - 1)
    HP = _round_up(halo, 128) if halo else 0
    TL = _pick_tl(L_out, C_in, C_out, K, HP)
    n_t = pl.cdiv(L_out, TL)
    total = (n_t + 1) * TL
    x_p = jnp.pad(x, ((0, 0), (0, 0), (p, total - p - L)))
    w, b = prep["w"], prep["b"]

    # TODO(synk): sweep pipeline_mode=pl.Buffered(3) on the x spec if DMA is still
    # exposed at the small-C / long-L tail stages.
    in_specs = [pl.BlockSpec((1, C_in, TL), lambda bb, l: (bb, 0, l))]
    args = [x_p]
    if HP:
        ratio = TL // HP
        in_specs.append(pl.BlockSpec((1, C_in, HP), lambda bb, l: (bb, 0, (l + 1) * ratio)))
        args.append(x_p)
    in_specs += [pl.BlockSpec(w.shape, lambda bb, l: (0, 0)),
                 pl.BlockSpec(b.shape, lambda bb, l: (0, 0))]
    args += [w, b]

    kernel = _make_conv_kernel(K, d, TL, bool(HP), in_lrelu_slope, out_tanh, vpu)
    y = pl.pallas_call(
        kernel,
        grid=(B, n_t),
        in_specs=in_specs,
        out_specs=pl.BlockSpec((1, C_out, TL), lambda bb, l: (bb, 0, l)),
        out_shape=jax.ShapeDtypeStruct((B, C_out, n_t * TL), jnp.float32),
        compiler_params=_compiler_params("parallel", "parallel"),
    )(*args)
    return y[:, :, :L_out]


# ---------------------------------------------------------------------------
# Polyphase ConvTranspose1d (no zero-stuffing): one MXU matmul per tile
# ---------------------------------------------------------------------------

def _make_poly_kernel(s, C_out, D, TL, has_halo, in_slope):
    def kernel(*refs):
        if has_halo:
            x_ref, xh_ref, w_ref, b_ref, o_ref = refs
            xw = jnp.concatenate([x_ref[0], xh_ref[0]], axis=-1)
        else:
            x_ref, w_ref, b_ref, o_ref = refs
            xw = x_ref[0]
        if in_slope is not None:
            xw = _lrelu(xw, in_slope)
        cols = [xw[:, dd:dd + TL] for dd in range(D)]
        xcol = (cols[0] if D == 1 else jnp.concatenate(cols, axis=0)).astype(MM_DTYPE)
        y = jnp.dot(w_ref[...], xcol, preferred_element_type=jnp.float32) + b_ref[...]
        for r in range(s):                     # (s*C_out, TL) -> per-phase planes
            o_ref[0, r] = y[r * C_out:(r + 1) * C_out, :].astype(o_ref.dtype)
    return kernel


def conv_transpose1d(x, prep, *, in_lrelu_slope=None):
    """PyTorch-style ConvTranspose1d via polyphase decomposition; phases interleaved outside."""
    B, C_in, L = x.shape
    s, K, p, D, LP, C_out = prep["s"], prep["K"], prep["p"], prep["D"], prep["LP"], prep["C_out"]
    L_out = (L - 1) * s - 2 * p + K
    Q = pl.cdiv(L_out, s)                       # outputs per phase (upper bound)
    H = D - 1
    HP = _round_up(H, 128) if H else 0
    TL = _pick_tl(Q, C_in, s * C_out, D, HP)
    n_t = pl.cdiv(Q, TL)
    total = (n_t + 1) * TL
    x_p = jnp.pad(x, ((0, 0), (0, 0), (LP, total - LP - L)))

    in_specs = [pl.BlockSpec((1, C_in, TL), lambda bb, l: (bb, 0, l))]
    args = [x_p]
    if HP:
        ratio = TL // HP
        in_specs.append(pl.BlockSpec((1, C_in, HP), lambda bb, l: (bb, 0, (l + 1) * ratio)))
        args.append(x_p)
    in_specs += [pl.BlockSpec(prep["w"].shape, lambda bb, l: (0, 0)),
                 pl.BlockSpec(prep["b"].shape, lambda bb, l: (0, 0))]
    args += [prep["w"], prep["b"]]

    kernel = _make_poly_kernel(s, C_out, D, TL, bool(HP), in_lrelu_slope)
    y4 = pl.pallas_call(
        kernel,
        grid=(B, n_t),
        in_specs=in_specs,
        out_specs=pl.BlockSpec((1, s, C_out, TL), lambda bb, l: (bb, 0, 0, l)),
        out_shape=jax.ShapeDtypeStruct((B, s, C_out, n_t * TL), jnp.float32),
        compiler_params=_compiler_params("parallel", "parallel"),
    )(*args)
    # interleave phases: y[..., q*s + r] = y4[:, r, :, q]
    # TODO(synk): an in-kernel strided lane store would avoid this extra HBM pass.
    y = jnp.transpose(y4, (0, 2, 3, 1)).reshape(B, C_out, n_t * TL * s)
    return y[:, :, :L_out]


# ---------------------------------------------------------------------------
# Fused ResBlock1 step:  x + conv2(lrelu(conv1(lrelu(x))))  [+ branch accumulator]
# ---------------------------------------------------------------------------

def _make_resblock_kernel(K1, d1, K2, TL, p2, PL, L1, slope, has_extra):
    U = TL + (K2 - 1)          # conv1 outputs needed per tile

    def kernel(*refs):
        if has_extra:
            x_ref, xh_ref, w1_ref, b1_ref, w2_ref, b2_ref, e_ref, o_ref = refs
        else:
            x_ref, xh_ref, w1_ref, b1_ref, w2_ref, b2_ref, o_ref = refs
        xw = jnp.concatenate([x_ref[0], xh_ref[0]], axis=-1)          # raw (C, TL+HP)
        xa = _lrelu(xw, slope)
        xcol1 = jnp.concatenate([xa[:, k * d1:k * d1 + U] for k in range(K1)],
                                axis=0).astype(MM_DTYPE)              # (K1*C, U)
        h = jnp.dot(w1_ref[...], xcol1, preferred_element_type=jnp.float32) + b1_ref[...]
        h = _lrelu(h, slope)
        # conv2 sees lrelu(conv1 out) zero-padded outside [0, L1) -> mask the halo positions
        pos = (pl.program_id(1) * TL - p2) + jax.lax.broadcasted_iota(jnp.int32, (1, U), 1)
        h = jnp.where((pos >= 0) & (pos < L1), h, 0.0)
        xcol2 = jnp.concatenate([h[:, k:k + TL] for k in range(K2)],
                                axis=0).astype(MM_DTYPE)              # (K2*C, TL)
        y = jnp.dot(w2_ref[...], xcol2, preferred_element_type=jnp.float32) + b2_ref[...]
        y = y + xw[:, PL:PL + TL]                                     # residual (raw x)
        if has_extra:
            y = y + e_ref[0]                                          # fused branch sum
        o_ref[0] = y.astype(o_ref.dtype)
    return kernel


def resblock_branch_step(x, prep, extra=None):
    B, C, L = x.shape
    K1, d1, K2 = prep["K1"], prep["d1"], prep["K2"]
    p1, p2 = prep["p1"], prep["p2"]
    halo1, halo2 = d1 * (K1 - 1), (K2 - 1)
    L1 = L + 2 * p1 - halo1
    L2 = L1 + 2 * p2 - halo2
    assert L2 == L, "resblock convs must be shape-preserving"
    PL = p1 + p2
    halo = halo1 + halo2
    HP = _round_up(max(halo, 1), 128)
    TL = _pick_tl(L, C, C, K1 + K2, HP)
    n_t = pl.cdiv(L, TL)
    total = (n_t + 1) * TL
    x_p = jnp.pad(x, ((0, 0), (0, 0), (PL, total - PL - L)))
    ratio = TL // HP

    in_specs = [pl.BlockSpec((1, C, TL), lambda bb, l: (bb, 0, l)),
                pl.BlockSpec((1, C, HP), lambda bb, l: (bb, 0, (l + 1) * ratio)),
                pl.BlockSpec(prep["w1"].shape, lambda bb, l: (0, 0)),
                pl.BlockSpec(prep["b1"].shape, lambda bb, l: (0, 0)),
                pl.BlockSpec(prep["w2"].shape, lambda bb, l: (0, 0)),
                pl.BlockSpec(prep["b2"].shape, lambda bb, l: (0, 0))]
    args = [x_p, x_p, prep["w1"], prep["b1"], prep["w2"], prep["b2"]]
    if extra is not None:
        e_p = jnp.pad(extra, ((0, 0), (0, 0), (0, n_t * TL - L)))
        in_specs.append(pl.BlockSpec((1, C, TL), lambda bb, l: (bb, 0, l)))
        args.append(e_p)

    kernel = _make_resblock_kernel(K1, d1, K2, TL, p2, PL, L1, LRELU_SLOPE, extra is not None)
    y = pl.pallas_call(
        kernel,
        grid=(B, n_t),
        in_specs=in_specs,
        out_specs=pl.BlockSpec((1, C, TL), lambda bb, l: (bb, 0, l)),
        out_shape=jax.ShapeDtypeStruct((B, C, n_t * TL), jnp.float32),
        compiler_params=_compiler_params("parallel", "parallel"),
    )(*args)
    return y[:, :, :L]


# ---------------------------------------------------------------------------
# Weight preparation (done once at init; weight_norm folded into plain weights)
# ---------------------------------------------------------------------------

def _prep_conv(w, b, *, dilation, padding, scale=1.0):
    C_out, C_in, K = w.shape
    wcol = jnp.transpose(w, (0, 2, 1)).reshape(C_out, K * C_in) * scale
    return dict(w=wcol.astype(MM_DTYPE), b=b.reshape(C_out, 1).astype(jnp.float32),
                K=K, d=dilation, p=padding, C_in=C_in, C_out=C_out, vpu=False)


def _prep_conv_post(w, b, *, padding, scale=1.0):
    C_out, C_in, K = w.shape
    assert C_out == 1
    return dict(w=(w[0] * scale).astype(jnp.float32), b=b.reshape(1, 1).astype(jnp.float32),
                K=K, d=1, p=padding, C_in=C_in, C_out=1, vpu=True)


def _prep_resblock(w1, b1, w2, b2, *, K, d):
    C = w1.shape[0]
    p1 = (K - 1) * d // 2
    p2 = (K - 1) // 2
    return dict(w1=jnp.transpose(w1, (0, 2, 1)).reshape(C, K * C).astype(MM_DTYPE),
                b1=b1.reshape(C, 1).astype(jnp.float32),
                w2=jnp.transpose(w2, (0, 2, 1)).reshape(C, K * C).astype(MM_DTYPE),
                b2=b2.reshape(C, 1).astype(jnp.float32),
                K1=K, d1=d, K2=K, p1=p1, p2=p2)


def _prep_upsample(w, b, *, stride, padding, scale=1.0):
    """ConvTranspose1d weight (C_in, C_out, K) -> polyphase matmul weight (s*C_out, D*C_in)."""
    C_in, C_out, K = w.shape
    s = stride
    P = K - 1 - padding
    assert P >= 0
    T = -(-K // s)                                 # ceil(K / s) taps per phase
    j0 = [(P - r) % s for r in range(s)]
    c = [-((P - r) // s) for r in range(s)]
    cmin, cmax = min(c), max(c)
    D = T + (cmax - cmin)                          # number of distinct input shifts
    LP = -cmin                                     # left zero-padding of the input
    w_eq = jnp.flip(jnp.transpose(w, (1, 0, 2)), axis=2)     # (C_out, C_in, K)
    zero = jnp.zeros((C_out, C_in), jnp.float32)
    rows = []
    for r in range(s):
        row = [zero] * D
        for t in range(T):
            j = j0[r] + t * s
            if j < K:
                row[t + c[r] - cmin] = w_eq[:, :, j]
        rows.append(jnp.concatenate(row, axis=1))
    wbig = (jnp.concatenate(rows, axis=0) * scale).astype(MM_DTYPE)
    bbig = jnp.tile(b.reshape(1, C_out), (s, 1)).reshape(s * C_out, 1).astype(jnp.float32)
    return dict(w=wbig, b=bbig, s=s, K=K, p=padding, D=D, LP=LP, C_in=C_in, C_out=C_out)


# ---------------------------------------------------------------------------
# HiFi-GAN v1 generator
# ---------------------------------------------------------------------------

class KeyGen:
    def __init__(self, key):
        self._key = key

    def __call__(self):
        self._key, sub = jax.random.split(self._key)
        return sub


def _init_conv(kg, c_out, c_in, k, scale=0.1):
    w = scale * jax.random.normal(kg(), (c_out, c_in, k), jnp.float32)
    b = scale * jax.random.normal(kg(), (c_out,), jnp.float32)
    return w, b


class HiFiGenerator:
    def __init__(self, kg, hidden_channels, upsample_initial_channel, upsample_rates,
                 upsample_kernel_sizes, resblock_kernel_sizes, resblock_dilation_sizes,
                 resblock=1, gin_channels=None):
        assert resblock == 1  # TODO(synk): ResBlock2 variant not implemented
        self.num_kernels = len(resblock_kernel_sizes)
        self.gin_channels = gin_channels
        inv_nk = 1.0 / self.num_kernels

        w, b = _init_conv(kg, upsample_initial_channel, hidden_channels, 7)
        self.conv_pre = _prep_conv(w, b, dilation=1, padding=3)

        self.ups = []
        self.resblocks = []
        ch = upsample_initial_channel
        for i, (u, k) in enumerate(zip(upsample_rates, upsample_kernel_sizes)):
            c_in, c_out = ch, ch // 2
            uw = 0.1 * jax.random.normal(kg(), (c_in, c_out, k), jnp.float32)  # ConvTranspose1d layout
            ub = 0.1 * jax.random.normal(kg(), (c_out,), jnp.float32)
            # the mean over resblock branches of the previous stage is folded into this
            # layer's weight (leaky_relu commutes with the positive 1/num_kernels scale)
            self.ups.append(_prep_upsample(uw, ub, stride=u, padding=(k - u) // 2,
                                           scale=(inv_nk if i > 0 else 1.0)))
            stage = []
            for krs, dils in zip(resblock_kernel_sizes, resblock_dilation_sizes):
                branch = []
                for d in dils:
                    w1, b1 = _init_conv(kg, c_out, c_out, krs)
                    w2, b2 = _init_conv(kg, c_out, c_out, krs)
                    branch.append(_prep_resblock(w1, b1, w2, b2, K=krs, d=d))
                stage.append(branch)
            self.resblocks.append(stage)
            ch = c_out

        w, b = _init_conv(kg, 1, ch, 7)
        self.conv_post = _prep_conv_post(w, b, padding=3, scale=inv_nk)

        self.cond = None
        if gin_channels is not None:
            cw, cb = _init_conv(kg, upsample_initial_channel, gin_channels, 1)
            self.cond = _prep_conv(cw, cb, dilation=1, padding=0)

    def __call__(self, z, cond=None):
        o = conv1d(z, self.conv_pre)
        if cond is not None and self.cond is not None:
            o = o + conv1d(cond, self.cond)
        for up, stage in zip(self.ups, self.resblocks):
            # leaky_relu(0.1) fused into the polyphase transposed-conv kernel
            o = conv_transpose1d(o, up, in_lrelu_slope=LRELU_SLOPE)
            acc = None
            for branch in stage:
                r = o
                for j, prep in enumerate(branch):
                    last = (j == len(branch) - 1)
                    # running branch sum fused into the last step of each branch
                    r = resblock_branch_step(r, prep, extra=(acc if last else None))
                acc = r
            o = acc  # 1/num_kernels is folded into the next layer's weights
        # final leaky_relu(0.01) + conv_post + tanh fused; C_out == 1 runs on the VPU
        return conv1d(o, self.conv_post, in_lrelu_slope=0.01, out_tanh=True)


# ---------------------------------------------------------------------------
# Decoder (matches the PyTorch module's forward semantics)
# ---------------------------------------------------------------------------

class Decoder:
    def __init__(self, key, input_sample_rate=22050, output_sample_rate=24000,
                 output_hop_length=256, ar_mel_length_compression=1024,
                 hidden_channels=1024, upsample_initial_channel=512,
                 upsample_rates=(8, 8, 2, 2), upsample_kernel_sizes=(16, 16, 4, 4),
                 resblock_kernel_sizes=(3, 7, 11),
                 resblock_dilation_sizes=((1, 3, 5), (1, 3, 5), (1, 3, 5)),
                 resblock=1, gin_channels: Optional[int] = None):
        kg = KeyGen(key)
        self.input_sample_rate = input_sample_rate
        self.output_sample_rate = output_sample_rate
        self.length_scale = ar_mel_length_compression / output_hop_length
        self.sr_scale = output_sample_rate / input_sample_rate
        g = math.gcd(ar_mel_length_compression, output_hop_length)
        self.ls_p, self.ls_q = ar_mel_length_compression // g, output_hop_length // g
        g = math.gcd(output_sample_rate, input_sample_rate)
        self.sr_p, self.sr_q = output_sample_rate // g, input_sample_rate // g
        self.vocoder = HiFiGenerator(kg, hidden_channels, upsample_initial_channel,
                                     upsample_rates, upsample_kernel_sizes,
                                     resblock_kernel_sizes, resblock_dilation_sizes,
                                     resblock=resblock, gin_channels=gin_channels)

    def __call__(self, x, cond=None):
        # x: (B, T, hidden_channels) -> transpose(1, 2) -> (B, C, T)
        z = jnp.transpose(x, (0, 2, 1))
        # length_scale (1024/256 = 4) takes the fast integer-scale polyphase path;
        # torch .squeeze(1) is a no-op here (C > 1)
        z = interpolate_rational(z, self.length_scale, self.ls_p, self.ls_q)
        if self.input_sample_rate != self.output_sample_rate:
            z = interpolate_rational(z, self.sr_scale, self.sr_p, self.sr_q)
            # TODO(synk): torch's .squeeze(0) only drops the batch dim when B == 1;
            # we keep the batch dim (exact match for B > 1).
        return self.vocoder(z, cond)


if __name__ == "__main__":
    root = jax.random.PRNGKey(0)
    pkey, xkey = jax.random.split(root)

    B, T, HC = 2, 8, 32
    dec = Decoder(
        pkey,
        hidden_channels=HC,
        upsample_initial_channel=32,
        upsample_rates=[2, 2],
        upsample_kernel_sizes=[4, 4],
        resblock_kernel_sizes=[3, 5],
        resblock_dilation_sizes=[[1, 3], [1, 3]],
    )
    x = jax.random.normal(xkey, (B, T, HC), jnp.float32)

    y = dec(x)                       # (B, 1, L_audio)
    jax.block_until_ready(y)
    print("KERNEL_OK")
</pallas_src>

<mosaic_0001>
module attributes {stable_mosaic.version = 11 : i64} {
  func.func @kernel(%arg0: i32, %arg1: i32, %arg2: memref<64x128xf32, #tpu.memory_space<vmem>>, %arg3: memref<64x128xf32, #tpu.memory_space<vmem>>, %arg4: memref<4x64x128xf32, #tpu.memory_space<vmem>>) attributes {dimension_semantics = [#tpu.dimension_semantics<parallel>, #tpu.dimension_semantics<parallel>], iteration_bounds = array<i64: 1, 1>, scalar_prefetch = 0 : i64, scratch_operands = 0 : i64, tpu.core_type = #tpu.core_type<tc>, window_params = [{transform_indices = @transform_0, window_bounds = array<i64: 64, 128>}, {transform_indices = @transform_1, window_bounds = array<i64: 64, 128>}, {transform_indices = @transform_2, window_bounds = array<i64: 4, 64, 128>}]} {
    %c0 = arith.constant 0 : index
    %c0_0 = arith.constant 0 : index
    %0 = vector.load %arg2[%c0, %c0_0] : memref<64x128xf32, #tpu.memory_space<vmem>>, vector<64x128xf32>
    %c0_1 = arith.constant 0 : index
    %c0_2 = arith.constant 0 : index
    %1 = vector.load %arg3[%c0_1, %c0_2] : memref<64x128xf32, #tpu.memory_space<vmem>>, vector<64x128xf32>
    %2 = tpu.concatenate %0, %1 in 1 : vector<64x128xf32>, vector<64x128xf32> -> vector<64x256xf32>
    %3 = vector.extract_strided_slice %2 {offsets = [0, 0], sizes = [64, 128], strides = [1, 1]} : vector<64x256xf32> to vector<64x128xf32>
    %cst = arith.constant 3.750000e-01 : f32
    %4 = vector.broadcast %cst : f32 to vector<64x128xf32>
    %5 = arith.mulf %4, %3 : vector<64x128xf32>
    %6 = vector.extract_strided_slice %2 {offsets = [0, 1], sizes = [64, 128], strides = [1, 1]} : vector<64x256xf32> to vector<64x128xf32>
    %cst_3 = arith.constant 6.250000e-01 : f32
    %7 = vector.broadcast %cst_3 : f32 to vector<64x128xf32>
    %8 = arith.mulf %7, %6 : vector<64x128xf32>
    %9 = arith.addf %5, %8 : vector<64x128xf32>
    %c0_4 = arith.constant 0 : index
    %c0_5 = arith.constant 0 : index
    %c0_6 = arith.constant 0 : index
    %10 = vector.load %arg4[%c0_4, %c0_5, %c0_6] : memref<4x64x128xf32, #tpu.memory_space<vmem>>, vector<1x64x128xf32>
    %11 = vector.shape_cast %10 : vector<1x64x128xf32> to vector<64x128xf32>
    %12 = vector.shape_cast %9 : vector<64x128xf32> to vector<1x64x128xf32>
    tpu.vector_store %arg4[%c0_4, %c0_5, %c0_6], %12 {strides = array<i32>} : memref<4x64x128xf32, #tpu.memory_space<vmem>>, vector<1x64x128xf32>,
    %13 = vector.extract_strided_slice %2 {offsets = [0, 0], sizes = [64, 128], strides = [1, 1]} : vector<64x256xf32> to vector<64x128xf32>
    %cst_7 = arith.constant 1.250000e-01 : f32
    %14 = vector.broadcast %cst_7 : f32 to vector<64x128xf32>
    %15 = arith.mulf %14, %13 : vector<64x128xf32>
    %16 = vector.extract_strided_slice %2 {offsets = [0, 1], sizes = [64, 128], strides = [1, 1]} : vector<64x256xf32> to vector<64x128xf32>
    %cst_8 = arith.constant 8.750000e-01 : f32
    %17 = vector.broadcast %cst_8 : f32 to vector<64x128xf32>
    %18 = arith.mulf %17, %16 : vector<64x128xf32>
    %19 = arith.addf %15, %18 : vector<64x128xf32>
    %c1 = arith.constant 1 : index
    %c0_9 = arith.constant 0 : index
    %c0_10 = arith.constant 0 : index
    %20 = vector.load %arg4[%c1, %c0_9, %c0_10] : memref<4x64x128xf32, #tpu.memory_space<vmem>>, vector<1x64x128xf32>
    %21 = vector.shape_cast %20 : vector<1x64x128xf32> to vector<64x128xf32>
    %22 = vector.shape_cast %19 : vector<64x128xf32> to vector<1x64x128xf32>
    tpu.vector_store %arg4[%c1, %c0_9, %c0_10], %22 {strides = array<i32>} : memref<4x64x128xf32, #tpu.memory_space<vmem>>, vector<1x64x128xf32>,
    %23 = vector.extract_strided_slice %2 {offsets = [0, 1], sizes = [64, 128], strides = [1, 1]} : vector<64x256xf32> to vector<64x128xf32>
    %cst_11 = arith.constant 8.750000e-01 : f32
    %24 = vector.broadcast %cst_11 : f32 to vector<64x128xf32>
    %25 = arith.mulf %24, %23 : vector<64x128xf32>
    %26 = vector.extract_strided_slice %2 {offsets = [0, 2], sizes = [64, 128], strides = [1, 1]} : vector<64x256xf32> to vector<64x128xf32>
    %cst_12 = arith.constant 1.250000e-01 : f32
    %27 = vector.broadcast %cst_12 : f32 to vector<64x128xf32>
    %28 = arith.mulf %27, %26 : vector<64x128xf32>
    %29 = arith.addf %25, %28 : vector<64x128xf32>
    %c2 = arith.constant 2 : index
    %c0_13 = arith.constant 0 : index
    %c0_14 = arith.constant 0 : index
    %30 = vector.load %arg4[%c2, %c0_13, %c0_14] : memref<4x64x128xf32, #tpu.memory_space<vmem>>, vector<1x64x128xf32>
    %31 = vector.shape_cast %30 : vector<1x64x128xf32> to vector<64x128xf32>
    %32 = vector.shape_cast %29 : vector<64x128xf32> to vector<1x64x128xf32>
    tpu.vector_store %arg4[%c2, %c0_13, %c0_14], %32 {strides = array<i32>} : memref<4x64x128xf32, #tpu.memory_space<vmem>>, vector<1x64x128xf32>,
    %33 = vector.extract_strided_slice %2 {offsets = [0, 1], sizes = [64, 128], strides = [1, 1]} : vector<64x256xf32> to vector<64x128xf32>
    %cst_15 = arith.constant 6.250000e-01 : f32
    %34 = vector.broadcast %cst_15 : f32 to vector<64x128xf32>
    %35 = arith.mulf %34, %33 : vector<64x128xf32>
    %36 = vector.extract_strided_slice %2 {offsets = [0, 2], sizes = [64, 128], strides = [1, 1]} : vector<64x256xf32> to vector<64x128xf32>
    %cst_16 = arith.constant 3.750000e-01 : f32
    %37 = vector.broadcast %cst_16 : f32 to vector<64x128xf32>
    %38 = arith.mulf %37, %36 : vector<64x128xf32>
    %39 = arith.addf %35, %38 : vector<64x128xf32>
    %c3 = arith.constant 3 : index
    %c0_17 = arith.constant 0 : index
    %c0_18 = arith.constant 0 : index
    %40 = vector.load %arg4[%c3, %c0_17, %c0_18] : memref<4x64x128xf32, #tpu.memory_space<vmem>>, vector<1x64x128xf32>
    %41 = vector.shape_cast %40 : vector<1x64x128xf32> to vector<64x128xf32>
    %42 = vector.shape_cast %39 : vector<64x128xf32> to vector<1x64x128xf32>
    tpu.vector_store %arg4[%c3, %c0_17, %c0_18], %42 {strides = array<i32>} : memref<4x64x128xf32, #tpu.memory_space<vmem>>, vector<1x64x128xf32>,
    return
  }
  func.func @transform_0(%arg0: i32, %arg1: i32) -> (i32, i32) {
    %c0_i32 = arith.constant 0 : i32
    return %arg0, %arg1 : i32, i32
  }
  func.func @transform_1(%arg0: i32, %arg1: i32) -> (i32, i32) {
    %c1_i32 = arith.constant 1 : i32
    %0 = arith.addi %arg1, %c1_i32 : i32
    %c1_i32_0 = arith.constant 1 : i32
    %1 = arith.muli %0, %c1_i32_0 : i32
    %c0_i32 = arith.constant 0 : i32
    return %arg0, %1 : i32, i32
  }
  func.func @transform_2(%arg0: i32, %arg1: i32) -> (i32, i32, i32) {
    %c0_i32 = arith.constant 0 : i32
    %c0_i32_0 = arith.constant 0 : i32
    return %c0_i32, %arg0, %arg1 : i32, i32, i32
  }
}

</mosaic_0001>

<bundles_post_ra>
// kernel: tpu_custom_call.1
= control target key start
LH: loop header
LB: loop body
LE: loop exit
PB: predicated region body
PF: predicated region fallthrough
CT: control target
= control target key end

     0   :  { %7 = vsyncpa [#allocation3], 0  ;;  %s1188_s0 = inlined_call_operand.hbm [shape: f32[64,256], index: 0, kind: input, shape index: {}]   ;;  %s1189_s1 = inlined_call_operand.hbm [shape: f32[64,256], index: 1, kind: input, shape index: {}]   ;;  %s1190_s2 = inlined_call_operand.hbm [shape: f32[4,64,128], index: 2, kind: output, shape index: {}]  }
   0x1   :  { %8 = vsyncpa [#allocation6], 0 }
   0x2   :  { %9 = vsyncpa [#allocation4], 0  ;;  %s14_s11 = sshll.u32 %s1188_s0, 4  ;;  %s718_s12 = smov [#allocation2]   ;;  %s15_s11 = int_to_ptr.hbm [resolvable:$true] %s14_s11 }
   0x3   :  { %s16_s13 = sshll.u32 %s718_s12, 4  ;;  %s719_s14 = smov 256   ;;  %s17_s13 = int_to_ptr.vmem [resolvable:$true] %s16_s13 }
   0x4   :  { %s720_s15 = smov 128   ;;  %s721_s16 = smov 8  }
   0x5   :  { %22 = dma.hbm_to_vmem [thread:$0]  %s15_s11, 1024, %s17_s13, [#allocation3], %s719_s14, %s720_s15, %s721_s16  }
   0x6   :  { %s632_s19 = scalar_lea.hbm %s1189_s1, 8  ;;  %s722_s21 = smov [#allocation5]  }
   0x7   :  { %s30_s20 = sshll.u32 %s632_s19, 4  ;;  %s32_s22 = sshll.u32 %s722_s21, 4  ;;  %s31_s20 = int_to_ptr.hbm [resolvable:$true] %s30_s20  ;;  %s33_s22 = int_to_ptr.vmem [resolvable:$true] %s32_s22 }
   0x8   :  { %38 = dma.hbm_to_vmem [thread:$0]  %s31_s20, 1024, %s33_s22, [#allocation6], %s719_s14, %s720_s15, %s721_s16  }
   0x9   :  { %712 = dma.done.wait [#allocation3], 1024  }
   0xa   :  { %713 = vsyncadd [#allocation3], 4294966272 }
   0xb   :  { %714 = dma.done.wait [#allocation6], 1024  }
   0xc   :  { %715 = vsyncadd [#allocation6], 4294966272  ;;  %v750_v0 = vld [vmem:[#allocation2 + $0x8] sm:$0xff]  ;;  %v752_v1 = vld [vmem:[#allocation2] sm:$0xff]  ;;  %s723_s0 = smov 127   ;;  %vm136_vm0 = vcmask 1039360  }
   0xd   :  { %v755_v2 = vmul.f32 0.625, %v750_v0  ;;  %v758_v3 = vmul.f32 0.625, %v752_v1  ;;  %v760_v4 = vld [vmem:[#allocation2 + $0x10] sm:$0xff]  ;;  %v769_v6 = vld [vmem:[#allocation5 + $0x8] sm:$0xff]  ;;  %v771_v7 = vld [vmem:[#allocation5] sm:$0xff]  ;;  %v858_v31 = vmul.f32 0.875, %v752_v1 }
   0xe   :  { %v767_v5 = vmul.f32 0.625, %v760_v4  ;;  %v775_v8 = vld [vmem:[#allocation5 + $0x10] sm:$0xff]  ;;  %v778_v9 = vmul.f32 0.625, %v769_v6  ;;  %v781_v10 = vmul.f32 0.625, %v771_v7  ;;  %v790_v12 = vld [vmem:[#allocation5 + $0x18] sm:$0xff]  ;;  %v796_v14 = vld [vmem:[#allocation2 + $0x20] sm:$0xff] }
   0xf   :  { %108 = vrot.lane.b32.xlu1 %v755_v2, %s723_s0  ;;  %104 = vrot.lane.b32.xlu0 %v758_v3, %s723_s0  ;;  %v784_v11 = vmul.f32 0.625, %v775_v8  ;;  %v792_v13 = vld [vmem:[#allocation2 + $0x18] sm:$0xff]  ;;  %v799_v15 = vmul.f32 0.625, %v790_v12  ;;  %v805_v17 = vmul.f32 0.625, %v796_v14  ;;  %v811_v18 = vld [vmem:[#allocation2 + $0x28] sm:$0xff]  ;;  %v813_v19 = vld [vmem:[#allocation5 + $0x20] sm:$0xff] }
  0x10   :  { %112 = vrot.lane.b32.xlu2 %v767_v5, %s723_s0  ;;  %v802_v16 = vmul.f32 0.625, %v792_v13  ;;  %v817_v20 = vld [vmem:[#allocation5 + $0x28] sm:$0xff]  ;;  %v820_v21 = vmul.f32 0.625, %v811_v18  ;;  %v823_v22 = vmul.f32 0.625, %v813_v19  ;;  %v832_v24 = vld [vmem:[#allocation5 + $0x30] sm:$0xff]  ;;  %v838_v26 = vld [vmem:[#allocation2 + $0x38] sm:$0xff] }
  0x11   :  { %1200 = vst [vmem:[#allocation11_spill] sm:$0xff] %v799_v15  ;;  %v826_v23 = vmul.f32 0.625, %v817_v20  ;;  %v834_v25 = vld [vmem:[#allocation2 + $0x30] sm:$0xff]  ;;  %v841_v27 = vmul.f32 0.625, %v832_v24  ;;  %v847_v29 = vmul.f32 0.625, %v838_v26  ;;  %v853_v30 = vld [vmem:[#allocation5 + $0x38] sm:$0xff] }
  0x12   :  { %1201 = vst [vmem:[#allocation12_spill] sm:$0xff] %v805_v17  ;;  %v844_v28 = vmul.f32 0.625, %v834_v25  ;;  %v861_v32 = vmul.f32 0.625, %v853_v30  ;;  %v864_v33 = vmul.f32 0.875, %v771_v7  ;;  %v873_v34 = vmul.f32 0.875, %v769_v6  ;;  %s724_s1 = smov [#allocation7]  }
  0x13   :  { %1202 = vst [vmem:[#allocation13_spill] sm:$0xff] %v820_v21  ;;  %v876_v35 = vmul.f32 0.875, %v750_v0  ;;  %v879_v36 = vmul.f32 0.875, %v760_v4  ;;  %v888_v37 = vmul.f32 0.875, %v792_v13  ;;  %v891_v38 = vmul.f32 0.875, %v775_v8  ;;  %s616_s23 = sshll.u32 %s724_s1, 4  ;;  %s617_s23 = int_to_ptr.vmem [resolvable:$true] %s616_s23 }
  0x14   :  { %1203 = vst [vmem:[#allocation14_spill] sm:$0xff] %v823_v22  ;;  %v894_v39 = vmul.f32 0.875, %v790_v12  ;;  %v903_v40 = vmul.f32 0.875, %v813_v19  ;;  %v906_v41 = vmul.f32 0.875, %v796_v14  ;;  %v909_v42 = vmul.f32 0.875, %v811_v18  ;;  %s618_s26 = sshll.u32 %s1190_s2, 4  ;;  %s619_s26 = int_to_ptr.hbm [resolvable:$true] %s618_s26 }
  0x15   :  { %1204 = vst [vmem:[#allocation15_spill] sm:$0xff] %v826_v23  ;;  %v918_v43 = vmul.f32 0.875, %v834_v25  ;;  %v921_v44 = vmul.f32 0.875, %v817_v20  ;;  %v924_v45 = vmul.f32 0.875, %v832_v24  ;;  %v933_v46 = vmul.f32 0.875, %v853_v30 }
  0x16   :  { %1205 = vst [vmem:[#allocation16_spill] sm:$0xff] %v841_v27  ;;  %v936_v47 = vmul.f32 0.875, %v838_v26  ;;  %v939_v48 = vmul.f32 0.125, %v752_v1  ;;  %v948_v49 = vmul.f32 0.125, %v750_v0  ;;  %v274_v50 = vmul.f32 0.125, %v771_v7 }
  0x17   :  { %110 = vrot.lane.b32.xlu1 %v778_v9, %s723_s0  ;;  %106 = vrot.lane.b32.xlu0 %v781_v10, %s723_s0  ;;  %1206 = vst [vmem:[#allocation17_spill] sm:$0xff] %v844_v28  ;;  %v275_v51 = vmul.f32 0.125, %v769_v6  ;;  %v276_v52 = vmul.f32 0.125, %v775_v8  ;;  %v958_v53 = vmul.f32 0.125, %v760_v4  ;;  %v961_v55 = vmul.f32 0.125, %v792_v13 }
  0x18   :  { %114 = vrot.lane.b32.xlu2 %v784_v11, %s723_s0  ;;  %1207 = vst [vmem:[#allocation18_spill] sm:$0xff] %v847_v29  ;;  %v969_v56 = vmul.f32 0.375, %v760_v4  ;;  %v972_v57 = vmul.f32 0.125, %v796_v14  ;;  %v277_v58 = vmul.f32 0.125, %v790_v12  ;;  %v278_v62 = vmul.f32 0.125, %v813_v19 }
  0x19   :  { %1208 = vst [vmem:[#allocation19_spill] sm:$0xff] %v861_v32  ;;  %v279_v63 = vmul.f32 0.125, %v817_v20  ;;  %v984_v4 = vmul.f32 0.125, %v811_v18 }
  0x1f   :  { %118 = vrot.lane.b32.xlu1 %v799_v15, %s723_s0  ;;  %116 = vrot.lane.b32.xlu0 %v802_v16, %s723_s0 }
  0x20   :  { %120 = vrot.lane.b32.xlu2 %v805_v17, %s723_s0 }
  0x27   :  { %124 = vrot.lane.b32.xlu1 %v820_v21, %s723_s0  ;;  %122 = vrot.lane.b32.xlu0 %v823_v22, %s723_s0 }
  0x28   :  { %126 = vrot.lane.b32.xlu2 %v826_v23, %s723_s0 }
  0x2f   :  { %130 = vrot.lane.b32.xlu1 %v841_v27, %s723_s0  ;;  %128 = vrot.lane.b32.xlu0 %v844_v28, %s723_s0 }
  0x30   :  { %132 = vrot.lane.b32.xlu2 %v847_v29, %s723_s0 }
  0x37   :  { %209 = vrot.lane.b32.xlu1 %v858_v31, %s723_s0  ;;  %134 = vrot.lane.b32.xlu0 %v861_v32, %s723_s0 }
  0x38   :  { %211 = vrot.lane.b32.xlu2 %v864_v33, %s723_s0 }
  0x3f   :  { %215 = vrot.lane.b32.xlu1 %v873_v34, %s723_s0  ;;  %213 = vrot.lane.b32.xlu0 %v876_v35, %s723_s0 }
  0x40   :  { %217 = vrot.lane.b32.xlu2 %v879_v36, %s723_s0 }
  0x47   :  { %221 = vrot.lane.b32.xlu1 %v888_v37, %s723_s0  ;;  %219 = vrot.lane.b32.xlu0 %v891_v38, %s723_s0 }
  0x48   :  { %223 = vrot.lane.b32.xlu2 %v894_v39, %s723_s0 }
  0x4f   :  { %227 = vrot.lane.b32.xlu1 %v903_v40, %s723_s0  ;;  %225 = vrot.lane.b32.xlu0 %v906_v41, %s723_s0 }
  0x50   :  { %229 = vrot.lane.b32.xlu2 %v909_v42, %s723_s0 }
  0x57   :  { %233 = vrot.lane.b32.xlu1 %v918_v43, %s723_s0  ;;  %231 = vrot.lane.b32.xlu0 %v921_v44, %s723_s0 }
  0x58   :  { %235 = vrot.lane.b32.xlu2 %v924_v45, %s723_s0 }
  0x5f   :  { %239 = vrot.lane.b32.xlu1 %v933_v46, %s723_s0  ;;  %237 = vrot.lane.b32.xlu0 %v936_v47, %s723_s0 }
  0x60   :  { %298 = vrot.lane.b32.xlu2 %v939_v48, %s723_s0 }
  0x67   :  { %302 = vrot.lane.b32.xlu1 %v948_v49, %s723_s0  ;;  %300 = vrot.lane.b32.xlu0 %v274_v50, %s723_s0 }
  0x68   :  { %304 = vrot.lane.b32.xlu2 %v275_v51, %s723_s0  ;;  %v987_v51 = vmul.f32 0.125, %v834_v25 }
  0x6a   :  { %v113_v54 = vpop.permute.xlu2 %112 }
  0x6f   :  { %308 = vrot.lane.b32.xlu1 %v276_v52, %s723_s0  ;;  %306 = vrot.lane.b32.xlu0 %v958_v53, %s723_s0 }
  0x70   :  { %310 = vrot.lane.b32.xlu2 %v961_v55, %s723_s0 }
  0x72   :  { %v115_v59 = vpop.permute.xlu2 %114 }
  0x73   :  { %v139_v60 = vsel %vm136_vm0, %v113_v54, %v115_v59  ;;  %v996_v59 = vmul.f32 0.125, %v838_v26 }
  0x74   :  { %v155_v61 = vadd.f32 %v139_v60, %v969_v56 }
  0x76   :  { %163 = vst [vmem:[#allocation7 + $0x10] sm:$0xff] %v155_v61  ;;  %v281_v61 = vmul.f32 0.125, %v853_v30 }
  0x77   :  { %314 = vrot.lane.b32.xlu1 %v972_v57, %s723_s0  ;;  %312 = vrot.lane.b32.xlu0 %v277_v58, %s723_s0  ;;  %v280_v58 = vmul.f32 0.125, %v832_v24 }
  0x78   :  { %316 = vrot.lane.b32.xlu2 %v278_v62, %s723_s0  ;;  %v1003_v62 = vmul.f32 0.375, %v750_v0  ;;  %v1014_v0 = vmul.f32 0.375, %v792_v13 }
  0x7a   :  { %v121_v50 = vpop.permute.xlu2 %120 }
  0x7f   :  { %320 = vrot.lane.b32.xlu1 %v279_v63, %s723_s0  ;;  %318 = vrot.lane.b32.xlu0 %v984_v4, %s723_s0  ;;  %v1006_v63 = vmul.f32 0.375, %v752_v1 }
  0x80   :  { %322 = vrot.lane.b32.xlu2 %v987_v51, %s723_s0 }
  0x81   :  { %v109_v52 = vpop.permute.xlu1 %108  ;;  %v105_v54 = vpop.permute.xlu0 %104 }
  0x82   :  { %v127_v60 = vpop.permute.xlu2 %126 }
  0x87   :  { %324 = vrot.lane.b32.xlu0 %v280_v58, %s723_s0  ;;  %326 = vrot.lane.b32.xlu1 %v996_v59, %s723_s0 }
  0x88   :  { %328 = vrot.lane.b32.xlu2 %v281_v61, %s723_s0 }
  0x89   :  { %v111_v29 = vpop.permute.xlu1 %110  ;;  %v107_v32 = vpop.permute.xlu0 %106 }
  0x8a   :  { %v138_v27 = vsel %vm136_vm0, %v109_v52, %v111_v29  ;;  %v137_v28 = vsel %vm136_vm0, %v105_v54, %v107_v32  ;;  %v133_v23 = vpop.permute.xlu2 %132  ;;  %v1019_v29 = vmul.f32 0.375, %v811_v18 }
  0x8b   :  { %v154_v21 = vadd.f32 %v138_v27, %v1003_v62  ;;  %v153_v58 = vadd.f32 %v137_v28, %v1006_v63  ;;  %v1022_v27 = vmul.f32 0.375, %v796_v14 }
  0x8d   :  { %162 = vst [vmem:[#allocation7 + $0x8] sm:$0xff] %v154_v21 }
  0x8e   :  { %161 = vst [vmem:[#allocation7] sm:$0xff] %v153_v58 }
  0x91   :  { %v119_v1 = vpop.permute.xlu1 %118  ;;  %v117_v17 = vpop.permute.xlu0 %116 }
  0x92   :  { %v140_v22 = vsel %vm136_vm0, %v117_v17, %v119_v1  ;;  %v212_v15 = vpop.permute.xlu2 %211 }
  0x93   :  { %v156_v61 = vadd.f32 %v140_v22, %v1014_v0  ;;  %v1029_v22 = vmul.f32 0.375, %v834_v25 }
  0x95   :  { %164 = vst [vmem:[#allocation7 + $0x18] sm:$0xff] %v156_v61 }
  0x99   :  { %v125_v28 = vpop.permute.xlu1 %124  ;;  %v123_v21 = vpop.permute.xlu0 %122 }
  0x9a   :  { %v142_v32 = vsel %vm136_vm0, %v125_v28, %v127_v60  ;;  %v141_v13 = vsel %vm136_vm0, %v121_v50, %v123_v21  ;;  %v218_v54 = vpop.permute.xlu2 %217  ;;  %v1034_v50 = vmul.f32 0.375, %v838_v26 }
  0x9b   :  { %v158_v52 = vadd.f32 %v142_v32, %v1019_v29  ;;  %v157_v17 = vadd.f32 %v141_v13, %v1022_v27 }
  0x9d   :  { %166 = vst [vmem:[#allocation7 + $0x28] sm:$0xff] %v158_v52 }
  0x9e   :  { %165 = vst [vmem:[#allocation7 + $0x20] sm:$0xff] %v157_v17 }
  0xa1   :  { %v131_v18 = vpop.permute.xlu1 %130  ;;  %v129_v58 = vpop.permute.xlu0 %128 }
  0xa2   :  { %v143_v14 = vsel %vm136_vm0, %v129_v58, %v131_v18  ;;  %v224_v60 = vpop.permute.xlu2 %223 }
  0xa3   :  { %v159_v1 = vadd.f32 %v143_v14, %v1029_v22 }
  0xa5   :  { %167 = vst [vmem:[#allocation7 + $0x30] sm:$0xff] %v159_v1 }
  0xa9   :  { %v210_v61 = vpop.permute.xlu1 %209  ;;  %v135_v28 = vpop.permute.xlu0 %134 }
  0xaa   :  { %v241_v21 = vsel %vm136_vm0, %v210_v61, %v212_v15  ;;  %v144_v32 = vsel %vm136_vm0, %v133_v23, %v135_v28  ;;  %v230_v52 = vpop.permute.xlu2 %229 }
  0xab   :  { %v257_v25 = vadd.f32 %v241_v21, %v939_v48  ;;  %v160_v13 = vadd.f32 %v144_v32, %v1034_v50 }
  0xad   :  { %266 = vst [vmem:[#allocation7 + $0x40] sm:$0xff] %v257_v25 }
  0xae   :  { %168 = vst [vmem:[#allocation7 + $0x38] sm:$0xff] %v160_v13 }
  0xb1   :  { %v216_v17 = vpop.permute.xlu1 %215  ;;  %v214_v18 = vpop.permute.xlu0 %213 }
  0xb2   :  { %v242_v58 = vsel %vm136_vm0, %v214_v18, %v216_v17  ;;  %v236_v61 = vpop.permute.xlu2 %235 }
  0xb3   :  { %v258_v26 = vadd.f32 %v242_v58, %v948_v49 }
  0xb5   :  { %267 = vst [vmem:[#allocation7 + $0x48] sm:$0xff] %v258_v26 }
  0xb9   :  { %v222_v14 = vpop.permute.xlu1 %221  ;;  %v220_v1 = vpop.permute.xlu0 %219 }
  0xba   :  { %v244_v15 = vsel %vm136_vm0, %v222_v14, %v224_v60  ;;  %v243_v23 = vsel %vm136_vm0, %v218_v54, %v220_v1  ;;  %v299_v13 = vpop.permute.xlu2 %298 }
  0xbb   :  { %v260_v48 = vadd.f32 %v244_v15, %v961_v55  ;;  %v259_v28 = vadd.f32 %v243_v23, %v958_v53 }
  0xbd   :  { %269 = vst [vmem:[#allocation7 + $0x58] sm:$0xff] %v260_v48 }
  0xbe   :  { %268 = vst [vmem:[#allocation7 + $0x50] sm:$0xff] %v259_v28 }
  0xc1   :  { %v228_v21 = vpop.permute.xlu1 %227  ;;  %v226_v32 = vpop.permute.xlu0 %225 }
  0xc2   :  { %v245_v25 = vsel %vm136_vm0, %v226_v32, %v228_v21  ;;  %v305_v58 = vpop.permute.xlu2 %304 }
  0xc3   :  { %v261_v49 = vadd.f32 %v245_v25, %v972_v57 }
  0xc5   :  { %270 = vst [vmem:[#allocation7 + $0x60] sm:$0xff] %v261_v49 }
  0xc9   :  { %v234_v17 = vpop.permute.xlu1 %233  ;;  %v232_v18 = vpop.permute.xlu0 %231 }
  0xca   :  { %v247_v60 = vsel %vm136_vm0, %v234_v17, %v236_v61  ;;  %v246_v54 = vsel %vm136_vm0, %v230_v52, %v232_v18  ;;  %v311_v15 = vpop.permute.xlu2 %310 }
  0xcb   :  { %v263_v55 = vadd.f32 %v247_v60, %v987_v51  ;;  %v262_v53 = vadd.f32 %v246_v54, %v984_v4 }
  0xcd   :  { %272 = vst [vmem:[#allocation7 + $0x70] sm:$0xff] %v263_v55 }
  0xce   :  { %271 = vst [vmem:[#allocation7 + $0x68] sm:$0xff] %v262_v53 }
  0xd1   :  { %v240_v26 = vpop.permute.xlu1 %239  ;;  %v238_v14 = vpop.permute.xlu0 %237 }
  0xd2   :  { %v248_v1 = vsel %vm136_vm0, %v238_v14, %v240_v26 }
  0xd3   :  { %v264_v57 = vadd.f32 %v248_v1, %v996_v59  ;;  %v357_v59 = vadd.f32 %v305_v58, %v873_v34 }
  0xd5   :  { %273 = vst [vmem:[#allocation7 + $0x78] sm:$0xff] %v264_v57 }
  0xd9   :  { %v303_v23 = vpop.permute.xlu1 %302  ;;  %v301_v48 = vpop.permute.xlu0 %300 }
  0xda   :  { %v331_v61 = vsel %vm136_vm0, %v303_v23, %v305_v58  ;;  %v330_v52 = vsel %vm136_vm0, %v299_v13, %v301_v48  ;;  %v355_v51 = vadd.f32 %v301_v48, %v864_v33  ;;  %v317_v13 = vpop.permute.xlu2 %316  ;;  %v443_v23 = vmul.f32 0.375, %v771_v7 }
  0xdb   :  { %v356_v4 = vadd.f32 %v331_v61, %v876_v35  ;;  %v354_v28 = vadd.f32 %v330_v52, %v858_v31  ;;  %v363_v54 = vadd.f32 %v317_v13, %v903_v40  ;;  %v446_v7 = vmul.f32 0.375, %v790_v12 }
  0xdc   :  { %388 = vrot.lane.b32.xlu1 %v355_v51, %s723_s0  ;;  %v449_v12 = vmul.f32 0.375, %v832_v24 }
  0xdd   :  { %390 = vrot.lane.b32.xlu2 %v356_v4, %s723_s0  ;;  %386 = vrot.lane.b32.xlu0 %v354_v28, %s723_s0 }
  0xe1   :  { %v309_v21 = vpop.permute.xlu1 %308  ;;  %v307_v32 = vpop.permute.xlu0 %306 }
  0xe2   :  { %v359_v25 = vadd.f32 %v309_v21, %v891_v38  ;;  %v332_v49 = vsel %vm136_vm0, %v307_v32, %v309_v21 }
  0xe3   :  { %v358_v33 = vadd.f32 %v332_v49, %v879_v36  ;;  %v323_v36 = vpop.permute.xlu2 %322 }
  0xe5   :  { %396 = vrot.lane.b32.xlu2 %v359_v25, %s723_s0  ;;  %392 = vrot.lane.b32.xlu0 %v357_v59, %s723_s0 }
  0xe6   :  { %394 = vrot.lane.b32.xlu1 %v358_v33, %s723_s0 }
  0xe9   :  { %v315_v31 = vpop.permute.xlu1 %314  ;;  %v313_v35 = vpop.permute.xlu0 %312 }
  0xea   :  { %v334_v17 = vsel %vm136_vm0, %v315_v31, %v317_v13  ;;  %v333_v34 = vsel %vm136_vm0, %v311_v15, %v313_v35  ;;  %v361_v18 = vadd.f32 %v313_v35, %v894_v39 }
  0xeb   :  { %v362_v38 = vadd.f32 %v334_v17, %v906_v41  ;;  %v360_v60 = vadd.f32 %v333_v34, %v888_v37  ;;  %v329_v37 = vpop.permute.xlu2 %328 }
  0xed   :  { %402 = vrot.lane.b32.xlu2 %v362_v38, %s723_s0  ;;  %398 = vrot.lane.b32.xlu0 %v360_v60, %s723_s0 }
  0xee   :  { %400 = vrot.lane.b32.xlu1 %v361_v18, %s723_s0 }
  0xf1   :  { %v321_v55 = vpop.permute.xlu1 %320  ;;  %v319_v53 = vpop.permute.xlu0 %318 }
  0xf2   :  { %v365_v58 = vadd.f32 %v321_v55, %v921_v44  ;;  %v335_v26 = vsel %vm136_vm0, %v319_v53, %v321_v55 }
  0xf3   :  { %v364_v39 = vadd.f32 %v335_v26, %v909_v42  ;;  %v369_v42 = vadd.f32 %v329_v37, %v933_v46 }
  0xf5   :  { %408 = vrot.lane.b32.xlu2 %v365_v58, %s723_s0  ;;  %404 = vrot.lane.b32.xlu0 %v363_v54, %s723_s0 }
  0xf6   :  { %406 = vrot.lane.b32.xlu1 %v364_v39, %s723_s0 }
  0xf9   :  { %v325_v41 = vpop.permute.xlu0 %324  ;;  %v327_v14 = vpop.permute.xlu1 %326 }
  0xfa   :  { %v336_v1 = vsel %vm136_vm0, %v323_v36, %v325_v41  ;;  %v367_v40 = vadd.f32 %v325_v41, %v924_v45  ;;  %v337_v57 = vsel %vm136_vm0, %v327_v14, %v329_v37  ;;  %v445_v45 = vmul.f32 0.375, %v775_v8 }
  0xfb   :  { %v366_v44 = vadd.f32 %v336_v1, %v918_v43  ;;  %v368_v15 = vadd.f32 %v337_v57, %v936_v47  ;;  %v444_v43 = vmul.f32 0.375, %v769_v6  ;;  %v447_v6 = vmul.f32 0.375, %v813_v19 }
  0xfc   :  { %v448_v8 = vmul.f32 0.375, %v817_v20  ;;  %v450_v19 = vmul.f32 0.375, %v853_v30 }
  0xfd   :  { %410 = vrot.lane.b32.xlu0 %v366_v44, %s723_s0  ;;  %414 = vrot.lane.b32.xlu2 %v368_v15, %s723_s0 }
  0xfe   :  { %412 = vrot.lane.b32.xlu1 %v367_v40, %s723_s0  ;;  %v1210_v40 = vld [vmem:[#allocation14_spill] sm:$0xff] }
 0x105   :  { %416 = vrot.lane.b32.xlu0 %v369_v42, %s723_s0  ;;  %469 = vrot.lane.b32.xlu2 %v443_v23, %s723_s0  ;;  %v1212_v23 = vld [vmem:[#allocation15_spill] sm:$0xff] }
 0x106   :  { %467 = vrot.lane.b32.xlu1 %v1006_v63, %s723_s0 }
 0x10d   :  { %471 = vrot.lane.b32.xlu0 %v1003_v62, %s723_s0  ;;  %475 = vrot.lane.b32.xlu2 %v969_v56, %s723_s0 }
 0x10e   :  { %473 = vrot.lane.b32.xlu1 %v444_v43, %s723_s0 }
 0x115   :  { %477 = vrot.lane.b32.xlu0 %v445_v45, %s723_s0  ;;  %481 = vrot.lane.b32.xlu2 %v446_v7, %s723_s0  ;;  %v1213_v7 = vld [vmem:[#allocation13_spill] sm:$0xff] }
 0x116   :  { %479 = vrot.lane.b32.xlu1 %v1014_v0, %s723_s0 }
 0x11d   :  { %483 = vrot.lane.b32.xlu0 %v1022_v27, %s723_s0  ;;  %487 = vrot.lane.b32.xlu2 %v1019_v29, %s723_s0 }
 0x11e   :  { %485 = vrot.lane.b32.xlu1 %v447_v6, %s723_s0 }
 0x125   :  { %489 = vrot.lane.b32.xlu0 %v448_v8, %s723_s0  ;;  %493 = vrot.lane.b32.xlu2 %v449_v12, %s723_s0  ;;  %v1214_v12 = vld [vmem:[#allocation17_spill] sm:$0xff] }
 0x126   :  { %491 = vrot.lane.b32.xlu1 %v1029_v22, %s723_s0 }
 0x12d   :  { %495 = vrot.lane.b32.xlu0 %v1034_v50, %s723_s0 }
 0x12e   :  { %497 = vrot.lane.b32.xlu1 %v450_v19, %s723_s0 }
 0x137   :  { %v391_v46 = vpop.permute.xlu2 %390 }
 0x13f   :  { %v397_v47 = vpop.permute.xlu2 %396 }
 0x147   :  { %v403_v56 = vpop.permute.xlu2 %402 }
 0x14e   :  { %v389_v20 = vpop.permute.xlu1 %388 }
 0x14f   :  { %v409_v62 = vpop.permute.xlu2 %408  ;;  %v387_v24 = vpop.permute.xlu0 %386 }
 0x150   :  { %v418_v63 = vsel %vm136_vm0, %v387_v24, %v389_v20  ;;  %v1216_v24 = vld [vmem:[#allocation19_spill] sm:$0xff] }
 0x151   :  { %435 = vst [vmem:[#allocation7 + $0x80] sm:$0xff] %v418_v63 }
 0x157   :  { %v393_v0 = vpop.permute.xlu0 %392  ;;  %v415_v29 = vpop.permute.xlu2 %414 }
 0x158   :  { %v395_v27 = vpop.permute.xlu1 %394  ;;  %v419_v22 = vsel %vm136_vm0, %v391_v46, %v393_v0  ;;  %v1215_v46 = vld [vmem:[#allocation16_spill] sm:$0xff]  ;;  %v1217_v0 = vld [vmem:[#allocation18_spill] sm:$0xff] }
 0x159   :  { %v420_v30 = vsel %vm136_vm0, %v395_v27, %v397_v47  ;;  %436 = vst [vmem:[#allocation7 + $0x88] sm:$0xff] %v419_v22 }
 0x15a   :  { %437 = vst [vmem:[#allocation7 + $0x90] sm:$0xff] %v420_v30 }
 0x15f   :  { %v399_v50 = vpop.permute.xlu0 %398  ;;  %v470_v48 = vpop.permute.xlu2 %469 }
 0x160   :  { %v401_v61 = vpop.permute.xlu1 %400  ;;  %v524_v52 = vadd.f32 %v470_v48, %v781_v10 }
 0x161   :  { %v421_v51 = vsel %vm136_vm0, %v399_v50, %v401_v61 }
 0x162   :  { %438 = vst [vmem:[#allocation7 + $0x98] sm:$0xff] %v421_v51  ;;  %557 = vrot.lane.b32.xlu0 %v524_v52, %s723_s0 }
 0x167   :  { %v405_v4 = vpop.permute.xlu0 %404  ;;  %v476_v31 = vpop.permute.xlu2 %475 }
 0x168   :  { %v407_v28 = vpop.permute.xlu1 %406  ;;  %v422_v59 = vsel %vm136_vm0, %v403_v56, %v405_v4 }
 0x169   :  { %v423_v21 = vsel %vm136_vm0, %v407_v28, %v409_v62  ;;  %439 = vst [vmem:[#allocation7 + $0xa0] sm:$0xff] %v422_v59 }
 0x16a   :  { %440 = vst [vmem:[#allocation7 + $0xa8] sm:$0xff] %v423_v21 }
 0x16f   :  { %v411_v32 = vpop.permute.xlu0 %410  ;;  %v482_v54 = vpop.permute.xlu2 %481 }
 0x170   :  { %v413_v25 = vpop.permute.xlu1 %412 }
 0x171   :  { %v424_v49 = vsel %vm136_vm0, %v411_v32, %v413_v25 }
 0x172   :  { %441 = vst [vmem:[#allocation7 + $0xb0] sm:$0xff] %v424_v49 }
 0x177   :  { %v417_v33 = vpop.permute.xlu0 %416 }
 0x178   :  { %v425_v10 = vsel %vm136_vm0, %v415_v29, %v417_v33  ;;  %v468_v13 = vpop.permute.xlu1 %467 }
 0x179   :  { %442 = vst [vmem:[#allocation7 + $0xb8] sm:$0xff] %v425_v10  ;;  %v499_v35 = vsel %vm136_vm0, %v468_v13, %v470_v48 }
 0x17a   :  { %v523_v17 = vadd.f32 %v499_v35, %v758_v3 }
 0x17c   :  { %555 = vrot.lane.b32.xlu2 %v523_v17, %s723_s0 }
 0x17f   :  { %v472_v34 = vpop.permute.xlu0 %471 }
 0x180   :  { %v474_v18 = vpop.permute.xlu1 %473 }
 0x181   :  { %v500_v38 = vsel %vm136_vm0, %v472_v34, %v474_v18  ;;  %v526_v60 = vadd.f32 %v474_v18, %v778_v9  ;;  %v1209_v9 = vld [vmem:[#allocation11_spill] sm:$0xff] }
 0x182   :  { %v525_v36 = vadd.f32 %v500_v38, %v755_v2  ;;  %v488_v2 = vpop.permute.xlu2 %487  ;;  %v530_v41 = vadd.f32 %v482_v54, %v1209_v9 }
 0x184   :  { %561 = vrot.lane.b32.xlu2 %v526_v60, %s723_s0  ;;  %559 = vrot.lane.b32.xlu1 %v525_v36, %s723_s0 }
 0x187   :  { %v478_v55 = vpop.permute.xlu0 %477 }
 0x188   :  { %v501_v53 = vsel %vm136_vm0, %v476_v31, %v478_v55  ;;  %v528_v3 = vadd.f32 %v478_v55, %v784_v11  ;;  %v480_v58 = vpop.permute.xlu1 %479 }
 0x189   :  { %v527_v26 = vadd.f32 %v501_v53, %v767_v5  ;;  %v502_v39 = vsel %vm136_vm0, %v480_v58, %v482_v54  ;;  %v1211_v5 = vld [vmem:[#allocation12_spill] sm:$0xff] }
 0x18a   :  { %v529_v37 = vadd.f32 %v502_v39, %v802_v16  ;;  %v494_v16 = vpop.permute.xlu2 %493 }
 0x18b   :  { %563 = vrot.lane.b32.xlu0 %v527_v26, %s723_s0  ;;  %v536_v47 = vadd.f32 %v494_v16, %v1215_v46 }
 0x18c   :  { %565 = vrot.lane.b32.xlu1 %v528_v3, %s723_s0  ;;  %567 = vrot.lane.b32.xlu2 %v529_v37, %s723_s0 }
 0x18f   :  { %v484_v14 = vpop.permute.xlu0 %483 }
 0x190   :  { %v486_v1 = vpop.permute.xlu1 %485 }
 0x191   :  { %v503_v11 = vsel %vm136_vm0, %v484_v14, %v486_v1  ;;  %v532_v57 = vadd.f32 %v486_v1, %v1210_v40 }
 0x192   :  { %v531_v44 = vadd.f32 %v503_v11, %v1211_v5 }
 0x193   :  { %569 = vrot.lane.b32.xlu0 %v530_v41, %s723_s0 }
 0x194   :  { %573 = vrot.lane.b32.xlu2 %v532_v57, %s723_s0  ;;  %571 = vrot.lane.b32.xlu1 %v531_v44, %s723_s0 }
 0x197   :  { %v490_v15 = vpop.permute.xlu0 %489 }
 0x198   :  { %v504_v42 = vsel %vm136_vm0, %v488_v2, %v490_v15  ;;  %v534_v43 = vadd.f32 %v490_v15, %v1212_v23  ;;  %v492_v45 = vpop.permute.xlu1 %491 }
 0x199   :  { %v533_v6 = vadd.f32 %v504_v42, %v1213_v7  ;;  %v505_v8 = vsel %vm136_vm0, %v492_v45, %v494_v16 }
 0x19a   :  { %v535_v19 = vadd.f32 %v505_v8, %v1214_v12 }
 0x19b   :  { %575 = vrot.lane.b32.xlu0 %v533_v6, %s723_s0 }
 0x19c   :  { %577 = vrot.lane.b32.xlu1 %v534_v43, %s723_s0  ;;  %579 = vrot.lane.b32.xlu2 %v535_v19, %s723_s0 }
 0x19f   :  { %v496_v56 = vpop.permute.xlu0 %495 }
 0x1a0   :  { %v498_v20 = vpop.permute.xlu1 %497 }
 0x1a1   :  { %v506_v62 = vsel %vm136_vm0, %v496_v56, %v498_v20  ;;  %v538_v63 = vadd.f32 %v498_v20, %v1216_v24 }
 0x1a2   :  { %v537_v29 = vadd.f32 %v506_v62, %v1217_v0 }
 0x1a3   :  { %581 = vrot.lane.b32.xlu0 %v536_v47, %s723_s0 }
 0x1a4   :  { %585 = vrot.lane.b32.xlu2 %v538_v63, %s723_s0  ;;  %583 = vrot.lane.b32.xlu1 %v537_v29, %s723_s0 }
 0x1d4   :  { %v558_v27 = vpop.permute.xlu0 %557 }
 0x1d6   :  { %v556_v22 = vpop.permute.xlu2 %555 }
 0x1d7   :  { %v587_v30 = vsel %vm136_vm0, %v556_v22, %v558_v27 }
 0x1d8   :  { %604 = vst [vmem:[#allocation7 + $0xc0] sm:$0xff] %v587_v30 }
 0x1de   :  { %v562_v50 = vpop.permute.xlu2 %561 }
 0x1e6   :  { %v568_v52 = vpop.permute.xlu2 %567 }
 0x1ee   :  { %v574_v59 = vpop.permute.xlu2 %573 }
 0x1f6   :  { %v560_v48 = vpop.permute.xlu1 %559  ;;  %v580_v33 = vpop.permute.xlu2 %579 }
 0x1f7   :  { %v588_v61 = vsel %vm136_vm0, %v560_v48, %v562_v50 }
 0x1f8   :  { %605 = vst [vmem:[#allocation7 + $0xc8] sm:$0xff] %v588_v61 }
 0x1fd   :  { %v564_v51 = vpop.permute.xlu0 %563 }
 0x1fe   :  { %v566_v4 = vpop.permute.xlu1 %565  ;;  %v586_v17 = vpop.permute.xlu2 %585 }
 0x1ff   :  { %v589_v28 = vsel %vm136_vm0, %v564_v51, %v566_v4 }
 0x200   :  { %606 = vst [vmem:[#allocation7 + $0xd0] sm:$0xff] %v589_v28 }
 0x205   :  { %v570_v21 = vpop.permute.xlu0 %569 }
 0x206   :  { %v590_v32 = vsel %vm136_vm0, %v568_v52, %v570_v21  ;;  %v572_v25 = vpop.permute.xlu1 %571 }
 0x207   :  { %607 = vst [vmem:[#allocation7 + $0xd8] sm:$0xff] %v590_v32  ;;  %v591_v49 = vsel %vm136_vm0, %v572_v25, %v574_v59 }
 0x208   :  { %608 = vst [vmem:[#allocation7 + $0xe0] sm:$0xff] %v591_v49 }
 0x20d   :  { %v576_v10 = vpop.permute.xlu0 %575 }
 0x20e   :  { %v578_v13 = vpop.permute.xlu1 %577 }
 0x20f   :  { %v592_v31 = vsel %vm136_vm0, %v576_v10, %v578_v13 }
 0x210   :  { %609 = vst [vmem:[#allocation7 + $0xe8] sm:$0xff] %v592_v31 }
 0x215   :  { %v582_v35 = vpop.permute.xlu0 %581 }
 0x216   :  { %v593_v34 = vsel %vm136_vm0, %v580_v33, %v582_v35  ;;  %v584_v18 = vpop.permute.xlu1 %583 }
 0x217   :  { %610 = vst [vmem:[#allocation7 + $0xf0] sm:$0xff] %v593_v34  ;;  %v594_v38 = vsel %vm136_vm0, %v584_v18, %v586_v17 }
 0x218   :  { %611 = vst [vmem:[#allocation7 + $0xf8] sm:$0xff] %v594_v38 }
 0x219   :  { %624 = dma.vmem_to_hbm [thread:$0]  %s617_s23, 4096, %s619_s26, [#allocation4], %s720_s15, %s720_s15, %s721_s16  }
 0x21a   :  { %716 = dma.done.wait [#allocation4], 4096  }
 0x21b   :  { %717 = vsyncadd [#allocation4], 4294963200 }
 0x21c   :  { %629 = vsyncpa [#allocation3], 1 }
 0x21d   :  { %630 = vsyncpa [#allocation6], 1 }
 0x21e   :  { %631 = vsyncpa [#allocation4], 1 }

</bundles_post_ra>
